<compile_context>
chip_gen: v5e
topology: v5e:2x2
jax: 0.10.0
libtpu: 0.0.40
codegen_flags: <defaults>
</compile_context>

<pallas_src>
import functools

import jax
import jax.numpy as jnp
from jax.experimental import pallas as pl
from jax.experimental.pallas import tpu as pltpu


# ----------------------------------------------------------------------------
# Path A: lane-aligned L (L % 128 == 0) — NCL output, L-tiled grid.
# ----------------------------------------------------------------------------
def _conv_tanh_ncl_tiled_kernel(xwin_ref, w_ref, b_ref, o_ref, *, k: int,
                                chunk: int):
    # xwin_ref: (C_in, l_tile + k - 1)  this tile's time window (causal halo
    #           from the previous tile / zero pad already included).
    # w_ref   : (C_out, C_in * k)       flattened weight, column index = i*k+j
    # b_ref   : (C_out, 1)
    # o_ref   : (C_out, l_tile)         NCL output tile (lanes = time, dense)
    c_out, l_tile = o_ref.shape
    c_in = xwin_ref.shape[0]

    w = w_ref[...].astype(jnp.float32)          # (C_out, C_in*k)
    bias = b_ref[...].astype(jnp.float32)       # (C_out, 1)
    # Hoist per-tap weight columns once per grid step (not per chunk/tap):
    # JAX does not CSE these slices if left inside the loops.
    w_cols = [w[:, c:c + 1] for c in range(c_in * k)]

    win = xwin_ref[...].astype(jnp.float32)     # (C_in, l_tile + k - 1)

    # Chunked accumulation: finish all taps + tanh + store for one 128-lane
    # chunk before moving on, keeping the f32 accumulator vreg-resident
    # (C_out x chunk = 32 vregs at C_out=256).
    for off in range(0, l_tile, chunk):
        acc = jnp.broadcast_to(bias, (c_out, chunk))            # bias folded in
        for i in range(c_in):
            for j in range(k):
                xs = win[i:i + 1, off + j:off + j + chunk]      # (1, chunk)
                acc = acc + w_cols[i * k + j] * xs              # VPU bcast-FMA
        o_ref[:, off:off + chunk] = jnp.tanh(acc).astype(o_ref.dtype)


def _forward_tiled(x_ncl, weight, bias, *, k, l_tile, chunk, out_dtype):
    B, C_in, L = x_ncl.shape
    C_out = weight.shape[0]
    halo = k - 1
    n_l = L // l_tile
    Lw = l_tile + halo

    # Causal left-pad, then stack the n_l overlapping per-tile windows so the
    # kernel only ever does static slices (no dynamic lane offsets).
    x_pad = jnp.pad(x_ncl, ((0, 0), (0, 0), (halo, 0)))         # (B,C_in,L+halo)
    x_win = jnp.stack(
        [x_pad[:, :, l * l_tile:l * l_tile + Lw] for l in range(n_l)],
        axis=1)                                                 # (B,n_l,C_in,Lw)

    w2d = weight.reshape(C_out, C_in * k)                       # col = i*k + j
    b2d = bias.reshape(C_out, 1)

    kernel = functools.partial(_conv_tanh_ncl_tiled_kernel, k=k, chunk=chunk)
    return pl.pallas_call(
        kernel,
        out_shape=jax.ShapeDtypeStruct((B, C_out, L), out_dtype),
        grid_spec=pltpu.PrefetchScalarGridSpec(
            num_scalar_prefetch=0,
            grid=(B, n_l),
            in_specs=[
                pl.BlockSpec((None, None, C_in, Lw),
                             lambda g, l: (g, l, 0, 0)),
                pl.BlockSpec((C_out, C_in * k), lambda g, l: (0, 0)),
                pl.BlockSpec((C_out, 1), lambda g, l: (0, 0)),
            ],
            out_specs=pl.BlockSpec((None, C_out, l_tile),
                                   lambda g, l: (g, 0, l)),
        ),
        compiler_params=pltpu.CompilerParams(
            dimension_semantics=("parallel", "parallel")),
    )(x_win, w2d, b2d)


# ----------------------------------------------------------------------------
# Path B: small L (< 128) — channels-on-lanes for dense stores.
# ----------------------------------------------------------------------------
def _conv_tanh_small_l_kernel(xt_ref, wt_ref, b_ref, o_ref, *, k: int):
    # xt_ref: (bb, L + k - 1, C_in)  time on sublanes (left-padded)
    # wt_ref: (C_in * k, C_out)
    # b_ref : (1, C_out)
    # o_ref : (bb, L, C_out)         channels on lanes -> dense stores
    bb, L, c_out = o_ref.shape
    c_in = xt_ref.shape[2]

    wt = wt_ref[...].astype(jnp.float32)
    bias = b_ref[...].astype(jnp.float32)                       # (1, C_out)
    # Hoisted out of the batch loop (JAX does not CSE these slices).
    w_rows = [wt[c:c + 1, :] for c in range(c_in * k)]          # each (1, C_out)

    for b in range(bb):   # bb <= 2 static unroll; use fori_loop if ever larger
        xb = xt_ref[b].astype(jnp.float32)                      # (L+k-1, C_in)
        acc = jnp.broadcast_to(bias, (L, c_out))                # bias folded in
        for i in range(c_in):
            for j in range(k):
                xcol = xb[j:j + L, i:i + 1]                     # (L, 1)
                acc = acc + xcol * w_rows[i * k + j]            # VPU bcast-FMA
        o_ref[b] = jnp.tanh(acc).astype(o_ref.dtype)            # EUP tanh


def _forward_small_l(x_ncl, weight, bias, *, k, out_dtype):
    B, C_in, L = x_ncl.shape
    C_out = weight.shape[0]
    halo = k - 1
    Lp = L + halo

    x_pad = jnp.pad(x_ncl, ((0, 0), (0, 0), (halo, 0)))         # (B, C_in, Lp)
    xt = jnp.transpose(x_pad, (0, 2, 1))                        # (B, Lp, C_in)
    wt = weight.reshape(C_out, C_in * k).T                      # (C_in*k, C_out)
    b2d = bias.reshape(1, C_out)

    # One grid step for the tiny default problem (no artificial batch split
    # on the 1-TC v5e/v6e parts); B/2 steps otherwise.
    bb = 2 if B % 2 == 0 else 1
    kernel = functools.partial(_conv_tanh_small_l_kernel, k=k)
    out_nlc = pl.pallas_call(
        kernel,
        out_shape=jax.ShapeDtypeStruct((B, L, C_out), out_dtype),
        grid_spec=pltpu.PrefetchScalarGridSpec(
            num_scalar_prefetch=0,
            grid=(B // bb,),
            in_specs=[
                pl.BlockSpec((bb, Lp, C_in), lambda g: (g, 0, 0)),
                pl.BlockSpec((C_in * k, C_out), lambda g: (0, 0)),
                pl.BlockSpec((1, C_out), lambda g: (0, 0)),
            ],
            out_specs=pl.BlockSpec((bb, L, C_out), lambda g: (g, 0, 0)),
        ),
        compiler_params=pltpu.CompilerParams(
            dimension_semantics=("parallel",)),
    )(xt, wt, b2d)
    # Small-L only: transpose back to PyTorch NCL. Cheap at L < 128 and buys
    # dense 256-lane stores inside the kernel instead of masked vst.msk.
    return jnp.transpose(out_nlc, (0, 2, 1))


# ----------------------------------------------------------------------------
# Public forward.
# ----------------------------------------------------------------------------
def context_embedding_forward(x_ncl, weight, bias, *, k, l_tile=None,
                              out_dtype=None):
    """tanh(causal_conv1d(x)) matching the PyTorch module; NCL in, NCL out.

    x_ncl: (B, C_in, L); weight: (C_out, C_in, k); bias: (C_out,).
    out_dtype: optionally jnp.bfloat16 — accumulation stays f32 and only the
    (writeback-dominant) stored stream shrinks.
    """
    _, _, L = x_ncl.shape
    if out_dtype is None:
        out_dtype = x_ncl.dtype

    if L >= 128 and L % 128 == 0:
        if l_tile is None:
            l_tile = next(t for t in (1024, 512, 256, 128) if L % t == 0)
        assert L % l_tile == 0 and l_tile % 128 == 0
        return _forward_tiled(x_ncl, weight, bias, k=k, l_tile=l_tile,
                              chunk=128, out_dtype=out_dtype)
    return _forward_small_l(x_ncl, weight, bias, k=k, out_dtype=out_dtype)


def _reference(x_ncl, weight, bias, k):
    # Pure-JAX reference of the causal conv + tanh (NCL).
    B, C_in, L = x_ncl.shape
    x_pad = jnp.pad(x_ncl, ((0, 0), (0, 0), (k - 1, 0)))
    out = jnp.zeros((B, weight.shape[0], L), jnp.float32)
    for j in range(k):
        out = out + jnp.einsum("oi,bit->bot", weight[:, :, j],
                               x_pad[:, :, j:j + L])
    return jnp.tanh(out + bias[None, :, None])


if __name__ == "__main__":
    # Module defaults: in_channels=1, embedding_size=256, kernel_size k=5.
    B, C_in, C_out, K = 2, 1, 256, 5

    key = jax.random.PRNGKey(0)
    kx1, kx2, kw, kb = jax.random.split(key, 4)
    weight = 0.1 * jax.random.normal(kw, (C_out, C_in, K), dtype=jnp.float32)
    bias = 0.1 * jax.random.normal(kb, (C_out,), dtype=jnp.float32)

    # 1) Small-L path (module's toy shape): channels-on-lanes stores.
    L_small = 16
    x_small = jax.random.normal(kx1, (B, C_in, L_small), dtype=jnp.float32)
    y_small = jax.block_until_ready(
        context_embedding_forward(x_small, weight, bias, k=K))
    assert y_small.shape == (B, C_out, L_small)
    assert jnp.allclose(y_small, _reference(x_small, weight, bias, K),
                        atol=1e-5, rtol=1e-5)

    # 2) Lane-aligned L path: NCL output, L-tiled grid (2 L-tiles of 128).
    L_big = 256
    x_big = jax.random.normal(kx2, (B, C_in, L_big), dtype=jnp.float32)
    y_big = jax.block_until_ready(
        context_embedding_forward(x_big, weight, bias, k=K, l_tile=128))
    assert y_big.shape == (B, C_out, L_big)
    assert jnp.allclose(y_big, _reference(x_big, weight, bias, K),
                        atol=1e-5, rtol=1e-5)

    print("KERNEL_OK")
</pallas_src>

<mosaic_0001>
module attributes {stable_mosaic.version = 11 : i64} {
  func.func @_conv_tanh_small_l_kernel(%arg0: i32, %arg1: memref<2x20x1xf32, #tpu.memory_space<vmem>>, %arg2: memref<5x256xf32, #tpu.memory_space<vmem>>, %arg3: memref<1x256xf32, #tpu.memory_space<vmem>>, %arg4: memref<2x16x256xf32, #tpu.memory_space<vmem>>) attributes {dimension_semantics = [#tpu.dimension_semantics<parallel>], iteration_bounds = array<i64: 1>, scalar_prefetch = 0 : i64, scratch_operands = 0 : i64, tpu.core_type = #tpu.core_type<tc>, window_params = [{transform_indices = @transform_0, window_bounds = array<i64: 2, 20, 1>}, {pipeline_mode = #tpu.pipeline_mode<synchronous>, transform_indices = @transform_1, window_bounds = array<i64: 5, 256>}, {pipeline_mode = #tpu.pipeline_mode<synchronous>, transform_indices = @transform_2, window_bounds = array<i64: 1, 256>}, {transform_indices = @transform_3, window_bounds = array<i64: 2, 16, 256>}]} {
    %c0 = arith.constant 0 : index
    %c0_0 = arith.constant 0 : index
    %0 = vector.load %arg2[%c0, %c0_0] : memref<5x256xf32, #tpu.memory_space<vmem>>, vector<5x256xf32>
    %c0_1 = arith.constant 0 : index
    %c0_2 = arith.constant 0 : index
    %1 = vector.load %arg3[%c0_1, %c0_2] : memref<1x256xf32, #tpu.memory_space<vmem>>, vector<1x256xf32>
    %2 = vector.extract_strided_slice %0 {offsets = [0, 0], sizes = [1, 256], strides = [1, 1]} : vector<5x256xf32> to vector<1x256xf32>
    %3 = vector.extract_strided_slice %0 {offsets = [1, 0], sizes = [1, 256], strides = [1, 1]} : vector<5x256xf32> to vector<1x256xf32>
    %4 = vector.extract_strided_slice %0 {offsets = [2, 0], sizes = [1, 256], strides = [1, 1]} : vector<5x256xf32> to vector<1x256xf32>
    %5 = vector.extract_strided_slice %0 {offsets = [3, 0], sizes = [1, 256], strides = [1, 1]} : vector<5x256xf32> to vector<1x256xf32>
    %6 = vector.extract_strided_slice %0 {offsets = [4, 0], sizes = [1, 256], strides = [1, 1]} : vector<5x256xf32> to vector<1x256xf32>
    %c0_3 = arith.constant 0 : index
    %c0_4 = arith.constant 0 : index
    %c0_5 = arith.constant 0 : index
    %7 = vector.load %arg1[%c0_3, %c0_4, %c0_5] : memref<2x20x1xf32, #tpu.memory_space<vmem>>, vector<1x20x1xf32>
    %8 = vector.shape_cast %7 : vector<1x20x1xf32> to vector<20x1xf32>
    %9 = vector.shape_cast %1 : vector<1x256xf32> to vector<1x256xf32>
    %10 = vector.broadcast %9 : vector<1x256xf32> to vector<16x256xf32>
    %11 = vector.extract_strided_slice %8 {offsets = [0, 0], sizes = [16, 1], strides = [1, 1]} : vector<20x1xf32> to vector<16x1xf32>
    %12 = vector.broadcast %11 : vector<16x1xf32> to vector<16x256xf32>
    %13 = vector.broadcast %2 : vector<1x256xf32> to vector<16x256xf32>
    %14 = arith.mulf %12, %13 : vector<16x256xf32>
    %15 = arith.addf %10, %14 : vector<16x256xf32>
    %16 = vector.extract_strided_slice %8 {offsets = [1, 0], sizes = [16, 1], strides = [1, 1]} : vector<20x1xf32> to vector<16x1xf32>
    %17 = vector.broadcast %16 : vector<16x1xf32> to vector<16x256xf32>
    %18 = vector.broadcast %3 : vector<1x256xf32> to vector<16x256xf32>
    %19 = arith.mulf %17, %18 : vector<16x256xf32>
    %20 = arith.addf %15, %19 : vector<16x256xf32>
    %21 = vector.extract_strided_slice %8 {offsets = [2, 0], sizes = [16, 1], strides = [1, 1]} : vector<20x1xf32> to vector<16x1xf32>
    %22 = vector.broadcast %21 : vector<16x1xf32> to vector<16x256xf32>
    %23 = vector.broadcast %4 : vector<1x256xf32> to vector<16x256xf32>
    %24 = arith.mulf %22, %23 : vector<16x256xf32>
    %25 = arith.addf %20, %24 : vector<16x256xf32>
    %26 = vector.extract_strided_slice %8 {offsets = [3, 0], sizes = [16, 1], strides = [1, 1]} : vector<20x1xf32> to vector<16x1xf32>
    %27 = vector.broadcast %26 : vector<16x1xf32> to vector<16x256xf32>
    %28 = vector.broadcast %5 : vector<1x256xf32> to vector<16x256xf32>
    %29 = arith.mulf %27, %28 : vector<16x256xf32>
    %30 = arith.addf %25, %29 : vector<16x256xf32>
    %31 = vector.extract_strided_slice %8 {offsets = [4, 0], sizes = [16, 1], strides = [1, 1]} : vector<20x1xf32> to vector<16x1xf32>
    %32 = vector.broadcast %31 : vector<16x1xf32> to vector<16x256xf32>
    %33 = vector.broadcast %6 : vector<1x256xf32> to vector<16x256xf32>
    %34 = arith.mulf %32, %33 : vector<16x256xf32>
    %35 = arith.addf %30, %34 : vector<16x256xf32>
    %36 = math.tanh %35 : vector<16x256xf32>
    %c0_6 = arith.constant 0 : index
    %c0_7 = arith.constant 0 : index
    %c0_8 = arith.constant 0 : index
    %37 = vector.load %arg4[%c0_6, %c0_7, %c0_8] : memref<2x16x256xf32, #tpu.memory_space<vmem>>, vector<1x16x256xf32>
    %38 = vector.shape_cast %37 : vector<1x16x256xf32> to vector<16x256xf32>
    %39 = vector.shape_cast %36 : vector<16x256xf32> to vector<1x16x256xf32>
    tpu.vector_store %arg4[%c0_6, %c0_7, %c0_8], %39 {strides = array<i32>} : memref<2x16x256xf32, #tpu.memory_space<vmem>>, vector<1x16x256xf32>,
    %c1 = arith.constant 1 : index
    %c0_9 = arith.constant 0 : index
    %c0_10 = arith.constant 0 : index
    %40 = vector.load %arg1[%c1, %c0_9, %c0_10] : memref<2x20x1xf32, #tpu.memory_space<vmem>>, vector<1x20x1xf32>
    %41 = vector.shape_cast %40 : vector<1x20x1xf32> to vector<20x1xf32>
    %42 = vector.shape_cast %1 : vector<1x256xf32> to vector<1x256xf32>
    %43 = vector.broadcast %42 : vector<1x256xf32> to vector<16x256xf32>
    %44 = vector.extract_strided_slice %41 {offsets = [0, 0], sizes = [16, 1], strides = [1, 1]} : vector<20x1xf32> to vector<16x1xf32>
    %45 = vector.broadcast %44 : vector<16x1xf32> to vector<16x256xf32>
    %46 = vector.broadcast %2 : vector<1x256xf32> to vector<16x256xf32>
    %47 = arith.mulf %45, %46 : vector<16x256xf32>
    %48 = arith.addf %43, %47 : vector<16x256xf32>
    %49 = vector.extract_strided_slice %41 {offsets = [1, 0], sizes = [16, 1], strides = [1, 1]} : vector<20x1xf32> to vector<16x1xf32>
    %50 = vector.broadcast %49 : vector<16x1xf32> to vector<16x256xf32>
    %51 = vector.broadcast %3 : vector<1x256xf32> to vector<16x256xf32>
    %52 = arith.mulf %50, %51 : vector<16x256xf32>
    %53 = arith.addf %48, %52 : vector<16x256xf32>
    %54 = vector.extract_strided_slice %41 {offsets = [2, 0], sizes = [16, 1], strides = [1, 1]} : vector<20x1xf32> to vector<16x1xf32>
    %55 = vector.broadcast %54 : vector<16x1xf32> to vector<16x256xf32>
    %56 = vector.broadcast %4 : vector<1x256xf32> to vector<16x256xf32>
    %57 = arith.mulf %55, %56 : vector<16x256xf32>
    %58 = arith.addf %53, %57 : vector<16x256xf32>
    %59 = vector.extract_strided_slice %41 {offsets = [3, 0], sizes = [16, 1], strides = [1, 1]} : vector<20x1xf32> to vector<16x1xf32>
    %60 = vector.broadcast %59 : vector<16x1xf32> to vector<16x256xf32>
    %61 = vector.broadcast %5 : vector<1x256xf32> to vector<16x256xf32>
    %62 = arith.mulf %60, %61 : vector<16x256xf32>
    %63 = arith.addf %58, %62 : vector<16x256xf32>
    %64 = vector.extract_strided_slice %41 {offsets = [4, 0], sizes = [16, 1], strides = [1, 1]} : vector<20x1xf32> to vector<16x1xf32>
    %65 = vector.broadcast %64 : vector<16x1xf32> to vector<16x256xf32>
    %66 = vector.broadcast %6 : vector<1x256xf32> to vector<16x256xf32>
    %67 = arith.mulf %65, %66 : vector<16x256xf32>
    %68 = arith.addf %63, %67 : vector<16x256xf32>
    %69 = math.tanh %68 : vector<16x256xf32>
    %c1_11 = arith.constant 1 : index
    %c0_12 = arith.constant 0 : index
    %c0_13 = arith.constant 0 : index
    %70 = vector.load %arg4[%c1_11, %c0_12, %c0_13] : memref<2x16x256xf32, #tpu.memory_space<vmem>>, vector<1x16x256xf32>
    %71 = vector.shape_cast %70 : vector<1x16x256xf32> to vector<16x256xf32>
    %72 = vector.shape_cast %69 : vector<16x256xf32> to vector<1x16x256xf32>
    tpu.vector_store %arg4[%c1_11, %c0_12, %c0_13], %72 {strides = array<i32>} : memref<2x16x256xf32, #tpu.memory_space<vmem>>, vector<1x16x256xf32>,
    return
  }
  func.func @transform_0(%arg0: i32) -> (i32, i32, i32) {
    %c0_i32 = arith.constant 0 : i32
    %c0_i32_0 = arith.constant 0 : i32
    %c0_i32_1 = arith.constant 0 : i32
    return %arg0, %c0_i32, %c0_i32_0 : i32, i32, i32
  }
  func.func @transform_1(%arg0: i32) -> (i32, i32) {
    %c0_i32 = arith.constant 0 : i32
    %c0_i32_0 = arith.constant 0 : i32
    %c0_i32_1 = arith.constant 0 : i32
    return %c0_i32, %c0_i32_0 : i32, i32
  }
  func.func @transform_2(%arg0: i32) -> (i32, i32) {
    %c0_i32 = arith.constant 0 : i32
    %c0_i32_0 = arith.constant 0 : i32
    %c0_i32_1 = arith.constant 0 : i32
    return %c0_i32, %c0_i32_0 : i32, i32
  }
  func.func @transform_3(%arg0: i32) -> (i32, i32, i32) {
    %c0_i32 = arith.constant 0 : i32
    %c0_i32_0 = arith.constant 0 : i32
    %c0_i32_1 = arith.constant 0 : i32
    return %arg0, %c0_i32, %c0_i32_0 : i32, i32, i32
  }
}

</mosaic_0001>

<bundles_post_ra>
// kernel: tpu_custom_call.1
= control target key start
LH: loop header
LB: loop body
LE: loop exit
PB: predicated region body
PF: predicated region fallthrough
CT: control target
= control target key end

     0   :  { %v417_v2 = vmov 0   ;;  %s746_s0 = inlined_call_operand.vmem [shape: f32[2,20,1], index: 0, kind: input, shape index: {}]   ;;  %s747_s1 = inlined_call_operand.vmem [shape: f32[5,256], index: 1, kind: input, shape index: {}]   ;;  %s748_s2 = inlined_call_operand.vmem [shape: f32[1,256], index: 2, kind: input, shape index: {}]   ;;  %s749_s3 = inlined_call_operand.hbm [shape: f32[2,16,256], index: 3, kind: output, shape index: {}]  }
   0x1   :  { %v20_v0 = vld [vmem:[%s746_s0 + $0x10] sm:$0xf]  ;;  %v18_v1 = vld [vmem:[%s746_s0] sm:$0xff]  ;;  %373 = vset.pattern.permute.xlu1 %v417_v2  ;;  %372 = vset.pattern.permute.xlu0 %v417_v2 }
   0x2   :  { %v366_v3 = vld [vmem:[%s746_s0 + $0x20] sm:$0xff]  ;;  %48 = vperm.xlu1 %373, %v20_v0   ;;  %28 = vperm.xlu0 %372, %v18_v1  }
   0x3   :  { %8 = vsyncpa [#allocation3], 0  ;;  %374 = vset.pattern.permute.xlu2 %v417_v2  ;;  %v365_v4 = vld [vmem:[%s746_s0 + $0x18] sm:$0xff]  ;;  %v19_v5 = vld [vmem:[%s746_s0 + $0x8] sm:$0xff]  ;;  %vm65_vm0 = vcmask 1046528   ;;  %vm98_vm1 = vcmask 1045504  }
   0x4   :  { %202 = vperm.xlu2 %374, %v366_v3   ;;  %v367_v6 = vld [vmem:[%s746_s0 + $0x28] sm:$0xf]  ;;  %v15_v7 = vld [vmem:[%s747_s1] sm:$0x1f]  ;;  %vm131_vm2 = vcmask 1044480   ;;  %vm164_vm3 = vcmask 1043456  }
   0x5   :  { %v16_v8 = vld [vmem:[%s747_s1 + $0x8] sm:$0x1f]  ;;  %v465_v9 = vperm.slane %v15_v7, 0  ;;  %v17_v11 = vld [vmem:[%s748_s2] sm:$0x3]  ;;  %v472_v12 = vperm.slane %v15_v7, 1 }
   0x6   :  { %v467_v10 = vperm.slane %v16_v8, 0  ;;  %v474_v13 = vperm.slane %v16_v8, 1  ;;  %v476_v14 = vperm.slane %v15_v7, 2  ;;  %v478_v15 = vperm.slane %v16_v8, 2  ;;  %s418_s0 = smov [#allocation2]   ;;  %s353_s4 = sshll.u32 %s749_s3, 4  ;;  %s354_s4 = int_to_ptr.hbm [resolvable:$true] %s353_s4 }
   0x7   :  { %v480_v17 = vperm.slane %v15_v7, 3  ;;  %v482_v18 = vperm.slane %v16_v8, 3  ;;  %v484_v19 = vperm.slane %v15_v7, 4  ;;  %v486_v20 = vperm.slane %v16_v8, 4  ;;  %s351_s1 = sshll.u32 %s418_s0, 4  ;;  %s419_s5 = smov 256   ;;  %s352_s1 = int_to_ptr.vmem [resolvable:$true] %s351_s1 }
   0x8   :  { %v488_v21 = vperm.slane %v17_v11, 0  ;;  %v490_v22 = vperm.slane %v17_v11, 1  ;;  %s420_s6 = smov 16  }
   0xa   :  { %197 = vperm.xlu1 %373, %v365_v4   ;;  %33 = vperm.xlu0 %372, %v19_v5  }
   0xc   :  { %215 = vperm.xlu2 %374, %v367_v6  }
  0x5e   :  { %v203_v16 = vpop.permute.xlu2 %202 }
  0x5f   :  { %v207_v23 = vmul.f32 %v203_v16, %v465_v9  ;;  %v208_v24 = vmul.f32 %v203_v16, %v467_v10  ;;  %v495_v25 = vmul.f32 %v203_v16, %v472_v12  ;;  %v498_v26 = vmul.f32 %v203_v16, %v474_v13 }
  0x60   :  { %v501_v27 = vmul.f32 %v203_v16, %v476_v14  ;;  %v504_v28 = vmul.f32 %v203_v16, %v478_v15  ;;  %v507_v29 = vmul.f32 %v203_v16, %v480_v17  ;;  %v510_v30 = vmul.f32 %v203_v16, %v482_v18 }
  0x61   :  { %v513_v31 = vmul.f32 %v203_v16, %v484_v19  ;;  %v516_v32 = vmul.f32 %v203_v16, %v486_v20  ;;  %v211_v33 = vadd.f32 %v207_v23, %v488_v21  ;;  %v212_v34 = vadd.f32 %v208_v24, %v490_v22 }
  0x62   :  { %v231_v35 = vrot.slane %v495_v25, 1  ;;  %v234_v36 = vrot.slane %v498_v26, 1  ;;  %v261_v37 = vrot.slane %v501_v27, 2  ;;  %v264_v38 = vrot.slane %v504_v28, 2 }
  0x63   :  { %v291_v40 = vrot.slane %v507_v29, 3  ;;  %v294_v41 = vrot.slane %v510_v30, 3  ;;  %v321_v42 = vrot.slane %v513_v31, 4  ;;  %v750_v43 = vrot.slane %v516_v32, 4 }
  0x66   :  { %v216_v39 = vpop.permute.xlu2 %215 }
  0x67   :  { %v222_v44 = vmul.f32 %v216_v39, %v472_v12  ;;  %v223_v45 = vmul.f32 %v216_v39, %v474_v13  ;;  %v252_v46 = vmul.f32 %v216_v39, %v476_v14  ;;  %v253_v47 = vmul.f32 %v216_v39, %v478_v15 }
  0x68   :  { %v282_v48 = vmul.f32 %v216_v39, %v480_v17  ;;  %v283_v49 = vmul.f32 %v216_v39, %v482_v18  ;;  %v312_v50 = vmul.f32 %v216_v39, %v484_v19  ;;  %v313_v51 = vmul.f32 %v216_v39, %v486_v20 }
  0x69   :  { %v236_v52 = vrot.slane %v222_v44, 1  ;;  %v238_v53 = vrot.slane %v223_v45, 1  ;;  %v266_v54 = vrot.slane %v252_v46, 2  ;;  %v268_v55 = vrot.slane %v253_v47, 2 }
  0x6a   :  { %v296_v56 = vrot.slane %v282_v48, 3  ;;  %v298_v57 = vrot.slane %v283_v49, 3  ;;  %v326_v58 = vrot.slane %v312_v50, 4  ;;  %v328_v59 = vrot.slane %v313_v51, 4 }
  0x6b   :  { %v237_v60 = vsel %vm65_vm0, %v231_v35, %v236_v52  ;;  %v239_v61 = vsel %vm65_vm0, %v234_v36, %v238_v53  ;;  %v267_v62 = vsel %vm98_vm1, %v261_v37, %v266_v54  ;;  %v269_v63 = vsel %vm98_vm1, %v264_v38, %v268_v55 }
  0x6c   :  { %v246_v0 = vadd.f32 %v237_v60, %v211_v33  ;;  %v247_v1 = vadd.f32 %v239_v61, %v212_v34  ;;  %v297_v2 = vsel %vm131_vm2, %v291_v40, %v296_v56  ;;  %v299_v3 = vsel %vm131_vm2, %v294_v41, %v298_v57 }
  0x6d   :  { %v327_v6 = vsel %vm164_vm3, %v321_v42, %v326_v58  ;;  %v329_v7 = vsel %vm164_vm3, %v750_v43, %v328_v59 }
  0x6e   :  { %v276_v4 = vadd.f32 %v267_v62, %v246_v0  ;;  %v277_v5 = vadd.f32 %v269_v63, %v247_v1 }
  0x70   :  { %v306_v8 = vadd.f32 %v297_v2, %v276_v4  ;;  %v307_v11 = vadd.f32 %v299_v3, %v277_v5 }
  0x72   :  { %v336_v16 = vadd.f32 %v327_v6, %v306_v8  ;;  %v337_v23 = vadd.f32 %v329_v7, %v307_v11 }
  0x74   :  { %375 = vtanh.f32 %v336_v16  ;;  %v560_v24 = vpop.permute.xlu1 %48  ;;  %v570_v39 = vpop.permute.xlu0 %28 }
  0x75   :  { %377 = vtanh.f32 %v337_v23  ;;  %v564_v33 = vmul.f32 %v472_v12, %v560_v24  ;;  %v568_v34 = vmul.f32 %v474_v13, %v560_v24  ;;  %v574_v44 = vmul.f32 %v476_v14, %v560_v24 }
  0x76   :  { %v578_v45 = vmul.f32 %v478_v15, %v560_v24  ;;  %v582_v46 = vmul.f32 %v480_v17, %v560_v24  ;;  %v586_v47 = vmul.f32 %v482_v18, %v560_v24  ;;  %v590_v48 = vmul.f32 %v484_v19, %v560_v24 }
  0x77   :  { %v38_v50 = vmul.f32 %v465_v9, %v570_v39  ;;  %v39_v51 = vmul.f32 %v467_v10, %v570_v39  ;;  %v599_v52 = vmul.f32 %v472_v12, %v570_v39  ;;  %v604_v55 = vmul.f32 %v474_v13, %v570_v39 }
  0x78   :  { %v608_v56 = vmul.f32 %v476_v14, %v570_v39  ;;  %v612_v57 = vmul.f32 %v478_v15, %v570_v39  ;;  %v618_v61 = vmul.f32 %v480_v17, %v570_v39  ;;  %v622_v62 = vmul.f32 %v482_v18, %v570_v39 }
  0x79   :  { %v626_v0 = vadd.f32 %v38_v50, %v488_v21  ;;  %v629_v1 = vadd.f32 %v39_v51, %v490_v22  ;;  %v66_v2 = vrot.slane %v599_v52, 1 }
  0x7a   :  { %v376_v53 = vpop.eup %375 }
  0x7b   :  { %v378_v58 = vpop.eup %377  ;;  %345 = vst [vmem:[#allocation2 + $0x30] sm:$0xff] %v376_v53 }
  0x7c   :  { %346 = vst [vmem:[#allocation2 + $0x38] sm:$0xff] %v378_v58  ;;  %v198_v3 = vpop.permute.xlu1 %197  ;;  %v648_v49 = vpop.permute.xlu0 %33 }
  0x7d   :  { %v205_v7 = vmul.f32 %v198_v3, %v465_v9  ;;  %v206_v8 = vmul.f32 %v198_v3, %v467_v10  ;;  %v218_v11 = vmul.f32 %v198_v3, %v472_v12  ;;  %v219_v16 = vmul.f32 %v198_v3, %v474_v13 }
  0x7e   :  { %v248_v23 = vmul.f32 %v198_v3, %v476_v14  ;;  %v249_v53 = vmul.f32 %v198_v3, %v478_v15  ;;  %v278_v5 = vmul.f32 %v198_v3, %v480_v17  ;;  %v279_v54 = vmul.f32 %v198_v3, %v482_v18 }
  0x7f   :  { %v209_v52 = vadd.f32 %v205_v7, %v488_v21  ;;  %v210_v58 = vadd.f32 %v206_v8, %v490_v22  ;;  %v230_v63 = vrot.slane %v218_v11, 1  ;;  %v233_v60 = vrot.slane %v219_v16, 1 }
  0x80   :  { %v260_v59 = vrot.slane %v248_v23, 2  ;;  %v263_v6 = vrot.slane %v249_v53, 2  ;;  %v308_v4 = vmul.f32 %v198_v3, %v484_v19  ;;  %v309_v16 = vmul.f32 %v198_v3, %v486_v20 }
  0x81   :  { %v232_v7 = vsel %vm65_vm0, %v230_v63, %v231_v35  ;;  %v235_v8 = vsel %vm65_vm0, %v233_v60, %v234_v36  ;;  %v290_v50 = vrot.slane %v278_v5, 3  ;;  %v293_v25 = vrot.slane %v279_v54, 3 }
  0x82   :  { %v262_v11 = vsel %vm98_vm1, %v260_v59, %v261_v37  ;;  %v244_v23 = vadd.f32 %v232_v7, %v209_v52  ;;  %v245_v53 = vadd.f32 %v235_v8, %v210_v58  ;;  %v265_v51 = vsel %vm98_vm1, %v263_v6, %v264_v38 }
  0x83   :  { %v320_v43 = vrot.slane %v308_v4, 4  ;;  %v323_v35 = vrot.slane %v309_v16, 4  ;;  %v40_v26 = vmul.f32 %v465_v9, %v648_v49  ;;  %v292_v27 = vsel %vm131_vm2, %v290_v50, %v291_v40 }
  0x84   :  { %v274_v36 = vadd.f32 %v262_v11, %v244_v23  ;;  %v275_v60 = vadd.f32 %v265_v51, %v245_v53  ;;  %v41_v37 = vmul.f32 %v467_v10, %v648_v49  ;;  %v295_v28 = vsel %vm131_vm2, %v293_v25, %v294_v41 }
  0x85   :  { %v322_v38 = vsel %vm164_vm3, %v320_v43, %v321_v42  ;;  %v751_v54 = vrot.slane %v516_v32, 4  ;;  %v44_v59 = vadd.f32 %v40_v26, %v488_v21  ;;  %v55_v10 = vmul.f32 %v472_v12, %v648_v49 }
  0x86   :  { %v304_v29 = vadd.f32 %v292_v27, %v274_v36  ;;  %v305_v63 = vadd.f32 %v295_v28, %v275_v60  ;;  %v45_v40 = vadd.f32 %v41_v37, %v490_v22  ;;  %v56_v30 = vmul.f32 %v474_v13, %v648_v49 }
  0x87   :  { %v325_v9 = vsel %vm164_vm3, %v323_v35, %v751_v54  ;;  %v88_v31 = vmul.f32 %v476_v14, %v648_v49  ;;  %v89_v32 = vmul.f32 %v478_v15, %v648_v49  ;;  %v121_v41 = vmul.f32 %v480_v17, %v648_v49 }
  0x88   :  { %v334_v21 = vadd.f32 %v322_v38, %v304_v29  ;;  %v335_v42 = vadd.f32 %v325_v9, %v305_v63  ;;  %v67_v43 = vrot.slane %v55_v10, 1  ;;  %v122_v22 = vmul.f32 %v482_v18, %v648_v49 }
  0x89   :  { %v70_v3 = vrot.slane %v56_v30, 1  ;;  %v100_v12 = vrot.slane %v88_v31, 2  ;;  %v103_v4 = vrot.slane %v89_v32, 2  ;;  %v133_v5 = vrot.slane %v121_v41, 3 }
  0x8a   :  { %379 = vtanh.f32 %v334_v21  ;;  %v68_v13 = vsel %vm65_vm0, %v66_v2, %v67_v43  ;;  %v752_v14 = vrot.slane %v564_v33, 1  ;;  %v136_v6 = vrot.slane %v122_v22, 3 }
  0x8b   :  { %381 = vtanh.f32 %v335_v42  ;;  %v753_v17 = vrot.slane %v604_v55, 1  ;;  %v754_v51 = vrot.slane %v568_v34, 1  ;;  %v80_v52 = vadd.f32 %v68_v13, %v626_v0 }
  0x8c   :  { %v73_v15 = vsel %vm65_vm0, %v67_v43, %v752_v14  ;;  %v755_v33 = vrot.slane %v608_v56, 2  ;;  %v756_v11 = vrot.slane %v612_v57, 2  ;;  %v757_v16 = vrot.slane %v574_v44, 2 }
  0x8d   :  { %v71_v50 = vsel %vm65_vm0, %v753_v17, %v70_v3  ;;  %v75_v18 = vsel %vm65_vm0, %v70_v3, %v754_v51  ;;  %v82_v7 = vadd.f32 %v73_v15, %v44_v59  ;;  %v758_v23 = vrot.slane %v578_v45, 2 }
  0x8e   :  { %v81_v58 = vadd.f32 %v71_v50, %v629_v1  ;;  %v83_v2 = vadd.f32 %v75_v18, %v45_v40  ;;  %v101_v8 = vsel %vm98_vm1, %v755_v33, %v100_v12  ;;  %v104_v55 = vsel %vm98_vm1, %v756_v11, %v103_v4 }
  0x8f   :  { %v106_v34 = vsel %vm98_vm1, %v100_v12, %v757_v16  ;;  %v108_v0 = vsel %vm98_vm1, %v103_v4, %v758_v23  ;;  %v113_v53 = vadd.f32 %v101_v8, %v80_v52  ;;  %v152_v1 = vmul.f32 %v484_v19, %v570_v39 }
  0x90   :  { %v114_v25 = vadd.f32 %v104_v55, %v81_v58  ;;  %v115_v56 = vadd.f32 %v106_v34, %v82_v7  ;;  %v116_v35 = vadd.f32 %v108_v0, %v83_v2  ;;  %v140_v26 = vrot.slane %v586_v47, 3  ;;  %v380_v45 = vpop.eup %379 }
  0x91   :  { %v157_v57 = vmul.f32 %v486_v20, %v560_v24  ;;  %v171_v44 = vrot.slane %v590_v48, 4  ;;  %v153_v36 = vmul.f32 %v486_v20, %v570_v39  ;;  %v759_v60 = vrot.slane %v618_v61, 3  ;;  %v382_v48 = vpop.eup %381  ;;  %343 = vst [vmem:[#allocation2 + $0x20] sm:$0xff] %v380_v45 }
  0x92   :  { %v760_v37 = vrot.slane %v622_v62, 3  ;;  %v761_v38 = vrot.slane %v582_v46, 3  ;;  %v154_v24 = vmul.f32 %v484_v19, %v648_v49  ;;  %v141_v39 = vsel %vm131_vm2, %v136_v6, %v140_v26  ;;  %344 = vst [vmem:[#allocation2 + $0x28] sm:$0xff] %v382_v48 }
  0x93   :  { %v134_v27 = vsel %vm131_vm2, %v759_v60, %v133_v5  ;;  %v155_v61 = vmul.f32 %v486_v20, %v648_v49  ;;  %v165_v59 = vrot.slane %v152_v1, 4  ;;  %v149_v29 = vadd.f32 %v141_v39, %v116_v35 }
  0x94   :  { %v137_v28 = vsel %vm131_vm2, %v760_v37, %v136_v6  ;;  %v139_v47 = vsel %vm131_vm2, %v133_v5, %v761_v38  ;;  %v146_v54 = vadd.f32 %v134_v27, %v113_v53  ;;  %v166_v63 = vrot.slane %v154_v24, 4 }
  0x95   :  { %v148_v9 = vadd.f32 %v139_v47, %v115_v56  ;;  %v147_v62 = vadd.f32 %v137_v28, %v114_v25  ;;  %v173_v46 = vrot.slane %v157_v57, 4  ;;  %v168_v40 = vrot.slane %v153_v36, 4 }
  0x96   :  { %v169_v10 = vrot.slane %v155_v61, 4  ;;  %v167_v30 = vsel %vm164_vm3, %v165_v59, %v166_v63  ;;  %v172_v19 = vsel %vm164_vm3, %v166_v63, %v171_v44 }
  0x97   :  { %v179_v41 = vadd.f32 %v167_v30, %v146_v54  ;;  %v181_v21 = vadd.f32 %v172_v19, %v148_v9 }
  0x98   :  { %v170_v31 = vsel %vm164_vm3, %v168_v40, %v169_v10  ;;  %v174_v32 = vsel %vm164_vm3, %v169_v10, %v173_v46 }
  0x99   :  { %v180_v42 = vadd.f32 %v170_v31, %v147_v62  ;;  %v182_v20 = vadd.f32 %v174_v32, %v149_v29  ;;  %383 = vtanh.f32 %v179_v41 }
  0x9b   :  { %385 = vtanh.f32 %v180_v42 }
  0x9c   :  { %387 = vtanh.f32 %v181_v21 }
  0x9d   :  { %389 = vtanh.f32 %v182_v20 }
  0x9f   :  { %v384_v49 = vpop.eup %383 }
  0xa0   :  { %187 = vst [vmem:[#allocation2] sm:$0xff] %v384_v49 }
  0xa1   :  { %v386_v43 = vpop.eup %385 }
  0xa2   :  { %v388_v22 = vpop.eup %387  ;;  %188 = vst [vmem:[#allocation2 + $0x8] sm:$0xff] %v386_v43 }
  0xa3   :  { %v390_v3 = vpop.eup %389  ;;  %189 = vst [vmem:[#allocation2 + $0x10] sm:$0xff] %v388_v22 }
  0xa4   :  { %190 = vst [vmem:[#allocation2 + $0x18] sm:$0xff] %v390_v3 }
  0xa5   :  { %359 = dma.vmem_to_hbm [thread:$0]  %s352_s1, 1024, %s354_s4, [#allocation3], %s419_s5, %s419_s5, %s420_s6  }
  0xa6   :  { %415 = dma.done.wait [#allocation3], 1024  }
  0xa7   :  { %416 = vsyncadd [#allocation3], 4294966272 }
  0xa8   :  { %364 = vsyncpa [#allocation3], 1 }

</bundles_post_ra>
